<compile_context>
chip_gen: v7x
topology: tpu7x:2x2x1
jax: 0.10.0
libtpu: 0.0.40
codegen_flags: <defaults>
</compile_context>

<pallas_src>
import math
import functools

import jax
import jax.numpy as jnp
from jax.experimental import pallas as pl
from jax.experimental.pallas import tpu as pltpu


# ---------------------------------------------------------------------------
# Helpers
# ---------------------------------------------------------------------------
def _round_up(n: int, q: int) -> int:
    return ((n + q - 1) // q) * q


def _bcast_batch(pe_tile, batch: int):
    # (tile_seq, D) -> (tile_seq, B*D) matching the (S, B*D) row-major layout
    # of x (columns ordered [b0 d0..dD-1, b1 d0..dD-1, ...]).
    if batch == 1:
        return pe_tile
    return jnp.concatenate([pe_tile] * batch, axis=-1)


# ---------------------------------------------------------------------------
# Kernels
# ---------------------------------------------------------------------------
def _pe_add_kernel(x_ref, pe_ref, o_ref, *, batch):
    # eval-mode forward: x + pe   (dropout is identity in eval)
    x = x_ref[...].astype(jnp.float32)
    pe = _bcast_batch(pe_ref[...].astype(jnp.float32), batch)
    o_ref[...] = (x + pe).astype(o_ref.dtype)


def _pe_add_dropout_kernel(seed_ref, x_ref, pe_ref, o_ref, *, p, batch):
    # training-mode forward: dropout(x + pe, p)
    x = x_ref[...].astype(jnp.float32)
    pe = _bcast_batch(pe_ref[...].astype(jnp.float32), batch)
    y = x + pe

    rows, cols = y.shape

    # ---- cheap stateless dropout mask -------------------------------------
    # Scalar base (seed mix + block offset): scalar-ALU work, hoisted off the
    # vector path.  Depends only on (seed, program_id) -> grid-order invariant.
    seed_u = seed_ref[0].astype(jnp.uint32)
    blk_u = pl.program_id(0).astype(jnp.uint32)
    base = (seed_u ^ jnp.uint32(0x85EBCA6B)) * jnp.uint32(0x9E3779B9) \
        + blk_u * jnp.uint32(rows * cols)

    # Per-element: shift+xor+add to form a counter, then mul / xorshift / mul.
    row_ids = jax.lax.broadcasted_iota(jnp.uint32, (rows, cols), 0)
    col_ids = jax.lax.broadcasted_iota(jnp.uint32, (rows, cols), 1)
    h = ((row_ids << 16) ^ col_ids) + base
    h = h * jnp.uint32(0x9E3779B1)
    h = h ^ (h >> 16)
    h = h * jnp.uint32(0x846CA68B)

    # Compare top 31 bits against a 31-bit threshold (signed compare, no
    # unsigned-compare / 24-bit shuffling needed).  drop iff h31 < thresh31.
    thresh31 = jnp.int32(min(int(round(p * float(1 << 32))), (1 << 32) - 1) >> 1)
    keep = (h >> 1).astype(jnp.int32) >= thresh31

    scale = jnp.float32(1.0 / (1.0 - p))
    o_ref[...] = jnp.where(keep, y * scale, jnp.float32(0.0)).astype(o_ref.dtype)
    # TODO(synk): mask uses a stateless hash, not torch's RNG stream (no bit-match).


# ---------------------------------------------------------------------------
# Parameter setup (mirrors PositionalEncoding.__init__)
# ---------------------------------------------------------------------------
def make_pe_table(d_model: int, max_len: int = 5000) -> jnp.ndarray:
    position = jnp.arange(max_len, dtype=jnp.float32)[:, None]            # (max_len, 1)
    div_term = jnp.exp(
        jnp.arange(0, d_model, 2, dtype=jnp.float32)
        * (-math.log(10000.0) / d_model)
    )                                                                     # (d_model/2,)
    pe = jnp.zeros((max_len, 1, d_model), dtype=jnp.float32)
    pe = pe.at[:, 0, 0::2].set(jnp.sin(position * div_term))
    pe = pe.at[:, 0, 1::2].set(jnp.cos(position * div_term))
    return pe                                                             # (max_len, 1, d_model)


# ---------------------------------------------------------------------------
# Tile-size selection (cdiv-friendly; no divisor search)
# ---------------------------------------------------------------------------
def _choose_tile_seq(S: int, bytes_per_row: int, sublane_q: int,
                     vmem_budget_bytes: int = 20 * 1024 * 1024) -> int:
    """Rows per block s.t. double-buffered (x + pe + out) tiles fit in ~20 MiB
    (under the 32 MiB vmem limit, safe on v5e/v6e/v7x).  Either the full S
    (single block: block dims == array dims, always layout-legal) or a
    multiple of the dtype sublane quantum; cdiv + partial last block handles
    awkward S."""
    cap = max(sublane_q, vmem_budget_bytes // max(1, 2 * bytes_per_row))
    if S <= cap:
        return S
    return max(sublane_q, (cap // sublane_q) * sublane_q)


# ---------------------------------------------------------------------------
# Wrapper
# ---------------------------------------------------------------------------
def positional_encoding_forward(x, pe, *, dropout_p: float = 0.1,
                                training: bool = False, seed: int = 0,
                                tile_seq: int | None = None):
    """x: (seq_len, batch, d_model); pe: (max_len, 1, d_model) f32."""
    S, B, D = x.shape
    assert pe.ndim == 3 and pe.shape[1] == 1 and pe.shape[2] == D and pe.shape[0] >= S

    BD = B * D
    x2 = x.reshape(S, BD)                          # free reshape (row-major)
    pe_rows = pe[:S, 0, :].astype(x.dtype)         # (S, D): streamed in x dtype

    itemsize = jnp.dtype(x.dtype).itemsize
    sublane_q = max(8, 32 // itemsize)             # 8 f32 / 16 bf16 / 32 int8
    if tile_seq is None:
        bytes_per_row = BD * itemsize * 2 + D * itemsize   # x + out + pe per seq-row
        tile_seq = _choose_tile_seq(S, bytes_per_row, sublane_q)
    grid = (pl.cdiv(S, tile_seq),)

    # Lane-dense stores when BD % 128 == 0; smaller BD still runs (masked vst).
    x_blk = pl.BlockSpec((tile_seq, BD), lambda i, *_: (i, 0))
    pe_blk = pl.BlockSpec((tile_seq, D), lambda i, *_: (i, 0))
    out_shape = jax.ShapeDtypeStruct((S, BD), x.dtype)
    cparams = pltpu.CompilerParams(
        dimension_semantics=("parallel",),         # disjoint output tiles; v7x 2-TC
        vmem_limit_bytes=32 * 1024 * 1024,
    )

    if training and dropout_p > 0.0:
        kernel = functools.partial(_pe_add_dropout_kernel, p=float(dropout_p), batch=B)
        gs = pltpu.PrefetchScalarGridSpec(
            num_scalar_prefetch=1, grid=grid,
            in_specs=[x_blk, pe_blk], out_specs=x_blk)
        seed_arr = jnp.array([seed], dtype=jnp.int32)
        y2 = pl.pallas_call(kernel, out_shape=out_shape, grid_spec=gs,
                            compiler_params=cparams)(seed_arr, x2, pe_rows)
    else:
        # NOTE: in a real model a lone broadcast-add is best left to XLA fusion;
        # kept as a kernel here so the deterministic path is kernel-checked.
        kernel = functools.partial(_pe_add_kernel, batch=B)
        gs = pltpu.PrefetchScalarGridSpec(
            num_scalar_prefetch=0, grid=grid,
            in_specs=[x_blk, pe_blk], out_specs=x_blk)
        y2 = pl.pallas_call(kernel, out_shape=out_shape, grid_spec=gs,
                            compiler_params=cparams)(x2, pe_rows)

    return y2.reshape(S, B, D)                     # free reshape back


# ---------------------------------------------------------------------------
# Main
# ---------------------------------------------------------------------------
if __name__ == "__main__":
    seq_len, batch, d_model = 8, 2, 64             # B*D = 128 -> lane-dense stores
    max_len = 64                                    # small max_len for the synthetic test
    dropout_p = 0.1

    key = jax.random.PRNGKey(0)
    x = jax.random.normal(key, (seq_len, batch, d_model), dtype=jnp.float32)
    pe = make_pe_table(d_model, max_len)

    # eval-mode forward (dropout is identity) — deterministic, checkable
    y_eval = positional_encoding_forward(x, pe, dropout_p=dropout_p, training=False)
    y_eval = jax.block_until_ready(y_eval)

    y_ref = x + pe[:seq_len]                        # reference (broadcast over batch)
    assert y_eval.shape == (seq_len, batch, d_model)
    assert jnp.allclose(y_eval, y_ref, atol=1e-6, rtol=1e-6)

    # awkward seq_len (prime) — exercises the cdiv / partial-block path
    seq_odd = 13
    x_odd = jax.random.normal(jax.random.PRNGKey(1), (seq_odd, batch, d_model),
                              dtype=jnp.float32)
    y_odd = positional_encoding_forward(x_odd, pe, dropout_p=dropout_p, training=False)
    y_odd = jax.block_until_ready(y_odd)
    assert jnp.allclose(y_odd, x_odd + pe[:seq_odd], atol=1e-6, rtol=1e-6)

    # training-mode forward (stochastic dropout via stateless hash) — structural check
    y_train = positional_encoding_forward(x, pe, dropout_p=dropout_p,
                                          training=True, seed=0)
    y_train = jax.block_until_ready(y_train)
    assert y_train.shape == (seq_len, batch, d_model)
    # every surviving element equals (x+pe)/(1-p); dropped elements are exactly 0
    scaled = y_ref / (1.0 - dropout_p)
    ok = jnp.logical_or(jnp.isclose(y_train, 0.0, atol=1e-6),
                        jnp.isclose(y_train, scaled, atol=1e-5, rtol=1e-5))
    assert bool(jnp.all(ok))
    assert bool(jnp.any(jnp.abs(y_train) > 0))      # some elements survived

    print("KERNEL_OK")
</pallas_src>

<mosaic_0001>
module attributes {stable_mosaic.version = 11 : i64} {
  func.func @_pe_add_kernel(%arg0: i32, %arg1: memref<8x128xf32, #tpu.memory_space<vmem>>, %arg2: memref<8x64xf32, #tpu.memory_space<vmem>>, %arg3: memref<8x128xf32, #tpu.memory_space<vmem>>) attributes {dimension_semantics = [#tpu.dimension_semantics<parallel>], iteration_bounds = array<i64: 1>, scalar_prefetch = 0 : i64, scratch_operands = 0 : i64, tpu.core_type = #tpu.core_type<tc>, window_params = [{transform_indices = @transform_0, window_bounds = array<i64: 8, 128>}, {transform_indices = @transform_1, window_bounds = array<i64: 8, 64>}, {transform_indices = @transform_2, window_bounds = array<i64: 8, 128>}]} {
    %c0 = arith.constant 0 : index
    %c0_0 = arith.constant 0 : index
    %0 = vector.load %arg1[%c0, %c0_0] : memref<8x128xf32, #tpu.memory_space<vmem>>, vector<8x128xf32>
    %c0_1 = arith.constant 0 : index
    %c0_2 = arith.constant 0 : index
    %1 = vector.load %arg2[%c0_1, %c0_2] : memref<8x64xf32, #tpu.memory_space<vmem>>, vector<8x64xf32>
    %2 = tpu.concatenate %1, %1 in 1 : vector<8x64xf32>, vector<8x64xf32> -> vector<8x128xf32>
    %3 = arith.addf %0, %2 : vector<8x128xf32>
    %c0_3 = arith.constant 0 : index
    %c0_4 = arith.constant 0 : index
    %4 = vector.load %arg3[%c0_3, %c0_4] : memref<8x128xf32, #tpu.memory_space<vmem>>, vector<8x128xf32>
    tpu.vector_store %arg3[%c0_3, %c0_4], %3 {strides = array<i32>} : memref<8x128xf32, #tpu.memory_space<vmem>>, vector<8x128xf32>,
    return
  }
  func.func @transform_0(%arg0: i32) -> (i32, i32) {
    %c0_i32 = arith.constant 0 : i32
    %c0_i32_0 = arith.constant 0 : i32
    return %arg0, %c0_i32 : i32, i32
  }
  func.func @transform_1(%arg0: i32) -> (i32, i32) {
    %c0_i32 = arith.constant 0 : i32
    %c0_i32_0 = arith.constant 0 : i32
    return %arg0, %c0_i32 : i32, i32
  }
  func.func @transform_2(%arg0: i32) -> (i32, i32) {
    %c0_i32 = arith.constant 0 : i32
    %c0_i32_0 = arith.constant 0 : i32
    return %arg0, %c0_i32 : i32, i32
  }
}

</mosaic_0001>

<bundles_post_ra>
// kernel: tpu_custom_call.1
= control target key start
LH: loop header
LB: loop body
LE: loop exit
PB: predicated region body
PF: predicated region fallthrough
CT: control target
= control target key end

     0   :  { %7 = vsyncpa [#allocation3], 0  ;;  %s193_s0 = inlined_call_operand.hbm [shape: f32[8,128], index: 0, kind: input, shape index: {}]   ;;  %s194_s1 = inlined_call_operand.hbm [shape: f32[8,64], index: 1, kind: input, shape index: {}]   ;;  %s195_s2 = inlined_call_operand.hbm [shape: f32[8,128], index: 2, kind: output, shape index: {}]  }
   0x1   :  { %8 = vsyncpa [#allocation6], 0 }
   0x2   :  { %9 = vsyncpa [#allocation4], 0  ;;  %s138_s9 = smov [#allocation2]   ;;  %s139_s11 = smov [#allocation5]  }
   0x3   :  { %s16_s10 = sshll.u32 %s138_s9, 4  ;;  %s26_s12 = sshll.u32 %s139_s11, 4  ;;  %s17_s10 = int_to_ptr.vmem [resolvable:$true] %s16_s10  ;;  %s27_s12 = int_to_ptr.vmem [resolvable:$true] %s26_s12 }
   0x4   :  { %s66_s15 = scalar_lea.hbm %s193_s0, 128 }
   0x5   :  { %p67_p0 = scmp.ne.s32.totalorder %s193_s0, %s66_s15  ;;  %p70_p1 = scmp.lt.u32.totalorder %s66_s15, %s193_s0 }
   0x7   :  { %p72_p2 = pnand %p70_p1, %p67_p0 }
   0x9   :  { %75 = shalt.err (!%p72_p2)
}
   0xa   :  { %s76_s20 = scalar_lea.vmem %s17_s10, 128  ;;  %p81_p4 = scmp.lt.s32.totalorder %s17_s10, %s17_s10 }
   0xb   :  { %p77_p3 = scmp.ne.s32.totalorder %s17_s10, %s76_s20  ;;  %p82_p5 = scmp.lt.s32.totalorder %s76_s20, %s76_s20 }
   0xd   :  { %p83_p6 = por %p82_p5, %p81_p4 }
   0xf   :  { %p84_p7 = pnand %p83_p6, %p77_p3 }
  0x11   :  { %87 = shalt.err (!%p84_p7)
}
  0x12   :  { %19 = dma.hbm_to_vmem [thread:$0]  %s193_s0, 128, %s17_s10, [#allocation3]  }
  0x13   :  { %s88_s25 = scalar_lea.hbm %s194_s1, 128 }
  0x14   :  { %p89_p8 = scmp.ne.s32.totalorder %s194_s1, %s88_s25  ;;  %p92_p9 = scmp.lt.u32.totalorder %s88_s25, %s194_s1 }
  0x16   :  { %p94_p10 = pnand %p92_p9, %p89_p8 }
  0x18   :  { %97 = shalt.err (!%p94_p10)
}
  0x19   :  { %s98_s30 = scalar_lea.vmem %s27_s12, 128  ;;  %p103_p12 = scmp.lt.s32.totalorder %s27_s12, %s27_s12 }
  0x1a   :  { %p99_p11 = scmp.ne.s32.totalorder %s27_s12, %s98_s30  ;;  %p104_p13 = scmp.lt.s32.totalorder %s98_s30, %s98_s30 }
  0x1c   :  { %p105_p0 = por %p104_p13, %p103_p12 }
  0x1e   :  { %p106_p1 = pnand %p105_p0, %p99_p11 }
  0x20   :  { %109 = shalt.err (!%p106_p1)
}
  0x21   :  { %29 = dma.hbm_to_vmem [thread:$0]  %s194_s1, 128, %s27_s12, [#allocation6]  }
  0x22   :  { %132 = dma.done.wait [#allocation3], 128  }
  0x23   :  { %133 = vsyncadd [#allocation3], 4294967168 }
  0x24   :  { %134 = dma.done.wait [#allocation6], 128  }
  0x25   :  { %135 = vsyncadd [#allocation6], 4294967168  ;;  %v37_v0 = vld [vmem:[#allocation5] sm:$0xff]  ;;  %s140_s4 = smov 64   ;;  %vm42_vm0 = vcmask 523264   ;;  %v36_v1 = vld [vmem:[#allocation2] sm:$0xff] }
  0x26   :  { %39 = vrot.lane.b32.xlu0 %v37_v0, %s140_s4  ;;  %s141_s5 = smov [#allocation7]  }
  0x27   :  { %s52_s6 = sshll.u32 %s141_s5, 4  ;;  %s53_s6 = int_to_ptr.vmem [resolvable:$true] %s52_s6 }
  0x28   :  { %s110_s7 = scalar_lea.vmem %s53_s6, 128  ;;  %p115_p3 = scmp.lt.s32.totalorder %s53_s6, %s53_s6 }
  0x29   :  { %p111_p2 = scmp.ne.s32.totalorder %s53_s6, %s110_s7  ;;  %p116_p4 = scmp.lt.s32.totalorder %s110_s7, %s110_s7 }
  0x2b   :  { %p117_p5 = por %p116_p4, %p115_p3 }
  0x2d   :  { %p118_p6 = pnand %p117_p5, %p111_p2 }
  0x98   :  { %v40_v2 = vpop.permute.xlu0 %39 }
  0x99   :  { %v43_v3 = vsel %vm42_vm0, %v37_v0, %v40_v2 }
  0x9a   :  { %v44_v4 = vadd.f32 %v43_v3, %v36_v1 }
  0x9c   :  { %45 = vst [vmem:[#allocation7] sm:$0xff] %v44_v4 }
  0x9d   :  { %121 = shalt.err (!%p118_p6)
}
  0x9e   :  { %s122_s9 = scalar_lea.hbm %s195_s2, 128 }
  0x9f   :  { %p123_p7 = scmp.ne.s32.totalorder %s195_s2, %s122_s9  ;;  %p126_p8 = scmp.lt.u32.totalorder %s122_s9, %s195_s2 }
  0xa1   :  { %p128_p9 = pnand %p126_p8, %p123_p7 }
  0xa3   :  { %131 = shalt.err (!%p128_p9)
}
  0xa4   :  { %55 = dma.vmem_to_hbm [thread:$0]  %s53_s6, 128, %s195_s2, [#allocation4]  }
  0xa5   :  { %136 = dma.done.wait [#allocation4], 128  }
  0xa6   :  { %137 = vsyncadd [#allocation4], 4294967168 }
  0xa7   :  { %59 = vsyncpa [#allocation3], 1 }
  0xa8   :  { %60 = vsyncpa [#allocation6], 1 }
  0xa9   :  { %61 = vsyncpa [#allocation4], 1 }

</bundles_post_ra>
